<compile_context>
chip_gen: v7x
topology: tpu7x:2x2x1
jax: 0.10.0
libtpu: 0.0.40
codegen_flags: <defaults>
</compile_context>

<pallas_src>
import functools

import jax
import jax.numpy as jnp
from jax.experimental import pallas as pl
from jax.experimental.pallas import tpu as pltpu

_EPS = 1e-6  # torch.nn.PairwiseDistance default eps (added to the difference)


def _round_up(x, m):
    return ((x + m - 1) // m) * m


def _cdiv(a, b):
    return -(-a // b)


def _vmem_cap_bytes():
    try:
        return int(pltpu.get_tpu_info().vmem_capacity_bytes)
    except Exception:
        return 64 * 1024 * 1024  # conservative fallback (v7x has 64 MiB / TC)


def _pick_tbp(batch_rows, g, dl_phys, stream_bytes, vmem_cap):
    """Packed-rows-per-tile: biggest multiple of 8 that (a) keeps the
    double-buffered (2, tbp, DL) input under ~1/3 of VMEM, (b) is <= 512 rows
    (already ~85% of HBM roofline), and (c) leaves >= 2 grid steps when the
    batch allows it so the 'parallel' axis spans both v7x TensorCores."""
    budget = vmem_cap // 3
    tbp_cap = budget // (2 * 2 * dl_phys * stream_bytes)  # 2 pipeline bufs x (2,tbp,DL)
    tbp_cap = max(8, (tbp_cap // 8) * 8)
    packed_rows = _cdiv(batch_rows, g)
    tbp_target = _round_up(max(_cdiv(packed_rows, 2), 8), 8)
    return max(8, min(512, tbp_cap, tbp_target))


def _transe_hinge_kernel(diff_ref, out_ref, *, margin, L, batch_size, g, d):
    """One grid step: (2, tbp, DL) stacked pos/neg diffs -> per-tile hinge sum.

    When g > 1, each 128-lane row packs g logical batch rows of width d; the
    per-row norm is a masked lane reduction per group (exact f32, MXU/XLU idle
    anyway since the kernel is HBM-bound)."""
    i = pl.program_id(0)

    # Upcast immediately after load (bf16 streaming only saves DMA bytes; v5e
    # has no bf16 VPU).
    pos = diff_ref[0].astype(jnp.float32)  # (tbp, DL)
    neg = diff_ref[1].astype(jnp.float32)  # (tbp, DL)
    tbp = pos.shape[0]

    if L == 2:
        pos2 = pos * pos
        neg2 = neg * neg
    else:
        # L1: fold the subtraction before the reduction -> one lane reduce.
        absdiff = jnp.abs(pos) - jnp.abs(neg)

    lane = jax.lax.broadcasted_iota(jnp.int32, pos.shape, 1)       # (tbp, DL)
    p_row = jax.lax.broadcasted_iota(jnp.int32, (tbp, 1), 0)       # (tbp, 1)

    total = jnp.zeros((), jnp.float32)
    for k in range(g):  # static unroll; g in {1, 2, 4, 8, 16}
        if g > 1:
            m = jnp.logical_and(lane >= k * d, lane < (k + 1) * d)
        if L == 2:
            pk = jnp.where(m, pos2, 0.0) if g > 1 else pos2
            nk = jnp.where(m, neg2, 0.0) if g > 1 else neg2
            delta = (jnp.sqrt(jnp.sum(pk, axis=-1, keepdims=True))
                     - jnp.sqrt(jnp.sum(nk, axis=-1, keepdims=True)))
        else:
            ck = jnp.where(m, absdiff, 0.0) if g > 1 else absdiff
            delta = jnp.sum(ck, axis=-1, keepdims=True)

        hinge = jnp.maximum(delta + margin, 0.0)                   # (tbp, 1)
        # Mask batch-padding rows (ragged tail): logical row of (packed row p,
        # group k) in tile i is (i*tbp + p)*g + k.
        row = (i * tbp + p_row) * g + k
        hinge = jnp.where(row < batch_size, hinge, 0.0)
        total = total + jnp.sum(hinge)

    # Lane/sublane-aligned (1, 8, 128) partial-sum block; JAX reads [i, 0, 0].
    out_ref[...] = jnp.full(out_ref.shape, total, out_ref.dtype)


def _transe_forward_ref(entity_emb, relation_emb, posX, negX, *, margin=1.0, L=2):
    """Pure-JAX reference (mirrors the PyTorch forward); also the fused-XLA
    bypass path for small problems."""
    def score(triples):
        h = jnp.take(entity_emb, triples[:, 0], axis=0)
        r = jnp.take(relation_emb, triples[:, 1], axis=0)
        t = jnp.take(entity_emb, triples[:, 2], axis=0)
        diff = h + r - t + _EPS
        if L == 2:
            return jnp.sqrt(jnp.sum(diff * diff, axis=-1))
        return jnp.sum(jnp.abs(diff), axis=-1)

    ps, ns = score(posX), score(negX)
    return jnp.sum(jnp.maximum(ps - ns + margin, 0.0)) / posX.shape[0]


def transe_forward(entity_emb, relation_emb, posX, negX, *, margin=1.0, L=2,
                   tb=None, stream_dtype=None, use_pallas=None):
    """Pallas implementation of TransE.forward(posX, negX).

    entity_emb:   (entityNum, D) float32
    relation_emb: (relationNum, D) float32
    posX, negX:   (B, 3) int32 triples [head, relation, tail]
    stream_dtype: dtype used to stream diffs through the kernel (e.g.
                  jnp.bfloat16 to halve kernel HBM bytes); accumulation is f32.
    use_pallas:   True/False to force, None = auto (bypass Pallas when small).
    returns:      scalar float32 loss
    """
    assert L in (1, 2)
    B = int(posX.shape[0])
    D = int(entity_emb.shape[1])

    # Small-problem bypass: below a few MiB of streamed diffs the fused XLA
    # gather+hinge beats launching a kernel plus the HBM round-trip of diffs.
    if use_pallas is None:
        use_pallas = (2 * B * D * 4) >= (4 << 20)
    if not use_pallas:
        return _transe_forward_ref(entity_emb, relation_emb, posX, negX,
                                   margin=margin, L=L)

    # Lane-dense, byte-neutral row packing: pack g = 128 // D rows per 128-lane
    # row when possible; otherwise stream D as-is (full-dim block is legal even
    # when D % 128 != 0) and just account for the physical lane padding in VMEM.
    if D % 128 != 0 and 128 % D == 0 and (128 // D) <= 16:
        g, DL = 128 // D, 128
    else:
        g, DL = 1, D

    stream_dtype = jnp.dtype(stream_dtype) if stream_dtype is not None else jnp.dtype(jnp.float32)
    stream_bytes = stream_dtype.itemsize

    vmem_cap = _vmem_cap_bytes()
    dl_phys = _round_up(DL, 128)  # physical lane footprint of one VMEM row
    if tb is None:
        tbp = _pick_tbp(B, g, dl_phys, stream_bytes, vmem_cap)
    else:
        tbp = max(8, ((int(tb) // g) // 8) * 8)   # user tb given in batch rows

    tile_rows = tbp * g
    num_tiles = _cdiv(B, tile_rows)
    B_pad = num_tiles * tile_rows

    # vmem_limit: double-buffered input (physical layout) + 16 MiB headroom for
    # outputs / compiler scratch, capped well below physical VMEM.
    tile_vmem = 2 * 2 * tbp * dl_phys * stream_bytes
    vmem_limit = int(min(vmem_cap * 3 // 4, max(tile_vmem + (16 << 20), 32 << 20)))

    # Gather + (h + r - t + eps) fused by XLA; kernel only streams the diffs.
    def diffs_for(triples):
        h = jnp.take(entity_emb, triples[:, 0], axis=0)
        r = jnp.take(relation_emb, triples[:, 1], axis=0)
        t = jnp.take(entity_emb, triples[:, 2], axis=0)
        return h + r - t + _EPS

    diffs = jnp.stack([diffs_for(posX), diffs_for(negX)], axis=0)
    if B_pad != B:
        diffs = jnp.pad(diffs, ((0, 0), (0, B_pad - B), (0, 0)))  # zero rows, masked in-kernel
    # Free (contiguous) reshape: pack g rows per lane row; no extra HBM bytes.
    diffs = diffs.reshape(2, B_pad // g, g * D).astype(stream_dtype)

    kernel = functools.partial(_transe_hinge_kernel, margin=float(margin), L=L,
                               batch_size=B, g=g, d=D)

    partials = pl.pallas_call(
        kernel,
        out_shape=jax.ShapeDtypeStruct((num_tiles, 8, 128), jnp.float32),
        grid_spec=pltpu.PrefetchScalarGridSpec(
            num_scalar_prefetch=0,
            grid=(num_tiles,),
            in_specs=[pl.BlockSpec((2, tbp, DL), lambda i: (0, i, 0))],
            out_specs=pl.BlockSpec((1, 8, 128), lambda i: (i, 0, 0)),
        ),
        compiler_params=pltpu.CompilerParams(
            dimension_semantics=("parallel",),
            vmem_limit_bytes=vmem_limit),
    )(diffs)

    return jnp.sum(partials[:, 0, 0]) / B


if __name__ == "__main__":
    key = jax.random.PRNGKey(0)
    (k_ent, k_rel, k_pos, k_neg,
     k_ent2, k_rel2, k_pos2, k_neg2) = jax.random.split(key, 8)

    def make_triples(k, batch, entityNum, relationNum):
        kh, kr, kt = jax.random.split(k, 3)
        h = jax.random.randint(kh, (batch, 1), 0, entityNum, jnp.int32)
        r = jax.random.randint(kr, (batch, 1), 0, relationNum, jnp.int32)
        t = jax.random.randint(kt, (batch, 1), 0, entityNum, jnp.int32)
        return jnp.concatenate([h, r, t], axis=1)

    # Case 1: packed-lane path (D=32 -> 4 rows per lane row), L=2, f32.
    entityNum, relationNum, D, batch = 50, 12, 32, 16
    ent = jax.random.normal(k_ent, (entityNum, D), jnp.float32)     # nn.Embedding: N(0,1)
    rel = jax.random.normal(k_rel, (relationNum, D), jnp.float32)
    pos = make_triples(k_pos, batch, entityNum, relationNum)
    neg = make_triples(k_neg, batch, entityNum, relationNum)

    f_l2 = jax.jit(functools.partial(transe_forward, margin=1.0, L=2, use_pallas=True))
    out = f_l2(ent, rel, pos, neg)
    jax.block_until_ready(out)
    ref = _transe_forward_ref(ent, rel, pos, neg, margin=1.0, L=2)
    assert jnp.allclose(out, ref, rtol=1e-5, atol=1e-5), (out, ref)

    # Case 2: ragged batch (13 rows) + L1 (folded |pos|-|neg| reduction).
    f_l1 = jax.jit(functools.partial(transe_forward, margin=2.0, L=1, use_pallas=True))
    out1 = f_l1(ent, rel, pos[:13], neg[:13])
    jax.block_until_ready(out1)
    ref1 = _transe_forward_ref(ent, rel, pos[:13], neg[:13], margin=2.0, L=1)
    assert jnp.allclose(out1, ref1, rtol=1e-5, atol=1e-5), (out1, ref1)

    # Case 3: bf16-streamed diffs (halves kernel HBM bytes), loose tolerance.
    f_bf16 = jax.jit(functools.partial(transe_forward, margin=1.0, L=2,
                                       use_pallas=True, stream_dtype=jnp.bfloat16))
    outb = f_bf16(ent, rel, pos, neg)
    jax.block_until_ready(outb)
    assert jnp.allclose(outb, ref, rtol=5e-2, atol=5e-2), (outb, ref)

    # Case 4: lane-wide embedding (D=200, g=1) across 2 grid tiles.
    entityNum2, relationNum2, D2, batch2 = 40, 9, 200, 24
    ent2 = jax.random.normal(k_ent2, (entityNum2, D2), jnp.float32)
    rel2 = jax.random.normal(k_rel2, (relationNum2, D2), jnp.float32)
    pos2 = make_triples(k_pos2, batch2, entityNum2, relationNum2)
    neg2 = make_triples(k_neg2, batch2, entityNum2, relationNum2)
    out2 = jax.jit(functools.partial(transe_forward, margin=1.0, L=2,
                                     use_pallas=True))(ent2, rel2, pos2, neg2)
    jax.block_until_ready(out2)
    ref2 = _transe_forward_ref(ent2, rel2, pos2, neg2, margin=1.0, L=2)
    assert jnp.allclose(out2, ref2, rtol=1e-5, atol=1e-5), (out2, ref2)

    # Case 5: auto mode picks the fused-XLA bypass at this tiny size.
    out_auto = jax.jit(functools.partial(transe_forward, margin=1.0, L=2))(ent, rel, pos, neg)
    jax.block_until_ready(out_auto)
    assert jnp.allclose(out_auto, ref, rtol=1e-5, atol=1e-5), (out_auto, ref)

    print("KERNEL_OK")
</pallas_src>

<mosaic_0001>
module attributes {stable_mosaic.version = 11 : i64} {
  func.func @_transe_hinge_kernel(%arg0: i32, %arg1: memref<2x8x128xf32, #tpu.memory_space<vmem>>, %arg2: memref<1x8x128xf32, #tpu.memory_space<vmem>>) attributes {dimension_semantics = [#tpu.dimension_semantics<parallel>], iteration_bounds = array<i64: 1>, scalar_prefetch = 0 : i64, scratch_operands = 0 : i64, tpu.core_type = #tpu.core_type<tc>, window_params = [{transform_indices = @transform_0, window_bounds = array<i64: 2, 8, 128>}, {transform_indices = @transform_1, window_bounds = array<i64: 1, 8, 128>}]} {
    %c0 = arith.constant 0 : index
    %c0_0 = arith.constant 0 : index
    %c0_1 = arith.constant 0 : index
    %0 = vector.load %arg1[%c0, %c0_0, %c0_1] : memref<2x8x128xf32, #tpu.memory_space<vmem>>, vector<1x8x128xf32>
    %1 = vector.shape_cast %0 : vector<1x8x128xf32> to vector<8x128xf32>
    %c1 = arith.constant 1 : index
    %c0_2 = arith.constant 0 : index
    %c0_3 = arith.constant 0 : index
    %2 = vector.load %arg1[%c1, %c0_2, %c0_3] : memref<2x8x128xf32, #tpu.memory_space<vmem>>, vector<1x8x128xf32>
    %3 = vector.shape_cast %2 : vector<1x8x128xf32> to vector<8x128xf32>
    %4 = arith.mulf %1, %1 : vector<8x128xf32>
    %5 = arith.mulf %3, %3 : vector<8x128xf32>
    %6 = tpu.iota {dimensions = array<i32: 1>} : vector<8x128xi32>
    %7 = tpu.iota {dimensions = array<i32: 0>} : vector<8x1xi32>
    %c0_i32 = arith.constant 0 : i32
    %8 = vector.broadcast %c0_i32 : i32 to vector<8x128xi32>
    %9 = arith.cmpi sge, %6, %8 : vector<8x128xi32>
    %c32_i32 = arith.constant 32 : i32
    %10 = vector.broadcast %c32_i32 : i32 to vector<8x128xi32>
    %11 = arith.cmpi slt, %6, %10 : vector<8x128xi32>
    %12 = arith.andi %9, %11 : vector<8x128xi1>
    %cst = arith.constant 0.000000e+00 : f32
    %13 = vector.broadcast %cst : f32 to vector<8x128xf32>
    %14 = arith.select %12, %4, %13 : vector<8x128xi1>, vector<8x128xf32>
    %cst_4 = arith.constant 0.000000e+00 : f32
    %15 = vector.broadcast %cst_4 : f32 to vector<8x128xf32>
    %16 = arith.select %12, %5, %15 : vector<8x128xi1>, vector<8x128xf32>
    %cst_5 = arith.constant dense<0.000000e+00> : vector<8xf32>
    %17 = vector.multi_reduction <add>, %14, %cst_5 [1] : vector<8x128xf32> to vector<8xf32>
    %18 = vector.shape_cast %17 : vector<8xf32> to vector<8x1xf32>
    %19 = math.sqrt %18 : vector<8x1xf32>
    %cst_6 = arith.constant dense<0.000000e+00> : vector<8xf32>
    %20 = vector.multi_reduction <add>, %16, %cst_6 [1] : vector<8x128xf32> to vector<8xf32>
    %21 = vector.shape_cast %20 : vector<8xf32> to vector<8x1xf32>
    %22 = math.sqrt %21 : vector<8x1xf32>
    %23 = arith.subf %19, %22 : vector<8x1xf32>
    %cst_7 = arith.constant 1.000000e+00 : f32
    %24 = vector.broadcast %cst_7 : f32 to vector<8x1xf32>
    %25 = arith.addf %23, %24 : vector<8x1xf32>
    %cst_8 = arith.constant 0.000000e+00 : f32
    %26 = vector.broadcast %cst_8 : f32 to vector<8x1xf32>
    %27 = arith.maximumf %25, %26 : vector<8x1xf32>
    %c8_i32 = arith.constant 8 : i32
    %28 = arith.muli %arg0, %c8_i32 : i32
    %29 = vector.broadcast %28 : i32 to vector<8x1xi32>
    %30 = arith.addi %29, %7 : vector<8x1xi32>
    %c4_i32 = arith.constant 4 : i32
    %31 = vector.broadcast %c4_i32 : i32 to vector<8x1xi32>
    %32 = arith.muli %30, %31 : vector<8x1xi32>
    %c0_i32_9 = arith.constant 0 : i32
    %33 = vector.broadcast %c0_i32_9 : i32 to vector<8x1xi32>
    %34 = arith.addi %32, %33 : vector<8x1xi32>
    %c16_i32 = arith.constant 16 : i32
    %35 = vector.broadcast %c16_i32 : i32 to vector<8x1xi32>
    %36 = arith.cmpi slt, %34, %35 : vector<8x1xi32>
    %cst_10 = arith.constant 0.000000e+00 : f32
    %37 = vector.broadcast %cst_10 : f32 to vector<8x1xf32>
    %38 = arith.select %36, %27, %37 : vector<8x1xi1>, vector<8x1xf32>
    %39 = vector.shape_cast %38 : vector<8x1xf32> to vector<1x8x1xf32>
    %cst_11 = arith.constant dense<0.000000e+00> : vector<1xf32>
    %40 = vector.multi_reduction <add>, %39, %cst_11 [1, 2] : vector<1x8x1xf32> to vector<1xf32>
    %41 = vector.shape_cast %40 : vector<1xf32> to vector<1x1x1xf32>
    %42 = vector.extract %41[0, 0, 0] : f32 from vector<1x1x1xf32>
    %cst_12 = arith.constant 0.000000e+00 : f32
    %43 = arith.addf %cst_12, %42 : f32
    %c32_i32_13 = arith.constant 32 : i32
    %44 = vector.broadcast %c32_i32_13 : i32 to vector<8x128xi32>
    %45 = arith.cmpi sge, %6, %44 : vector<8x128xi32>
    %c64_i32 = arith.constant 64 : i32
    %46 = vector.broadcast %c64_i32 : i32 to vector<8x128xi32>
    %47 = arith.cmpi slt, %6, %46 : vector<8x128xi32>
    %48 = arith.andi %45, %47 : vector<8x128xi1>
    %cst_14 = arith.constant 0.000000e+00 : f32
    %49 = vector.broadcast %cst_14 : f32 to vector<8x128xf32>
    %50 = arith.select %48, %4, %49 : vector<8x128xi1>, vector<8x128xf32>
    %cst_15 = arith.constant 0.000000e+00 : f32
    %51 = vector.broadcast %cst_15 : f32 to vector<8x128xf32>
    %52 = arith.select %48, %5, %51 : vector<8x128xi1>, vector<8x128xf32>
    %cst_16 = arith.constant dense<0.000000e+00> : vector<8xf32>
    %53 = vector.multi_reduction <add>, %50, %cst_16 [1] : vector<8x128xf32> to vector<8xf32>
    %54 = vector.shape_cast %53 : vector<8xf32> to vector<8x1xf32>
    %55 = math.sqrt %54 : vector<8x1xf32>
    %cst_17 = arith.constant dense<0.000000e+00> : vector<8xf32>
    %56 = vector.multi_reduction <add>, %52, %cst_17 [1] : vector<8x128xf32> to vector<8xf32>
    %57 = vector.shape_cast %56 : vector<8xf32> to vector<8x1xf32>
    %58 = math.sqrt %57 : vector<8x1xf32>
    %59 = arith.subf %55, %58 : vector<8x1xf32>
    %cst_18 = arith.constant 1.000000e+00 : f32
    %60 = vector.broadcast %cst_18 : f32 to vector<8x1xf32>
    %61 = arith.addf %59, %60 : vector<8x1xf32>
    %cst_19 = arith.constant 0.000000e+00 : f32
    %62 = vector.broadcast %cst_19 : f32 to vector<8x1xf32>
    %63 = arith.maximumf %61, %62 : vector<8x1xf32>
    %c8_i32_20 = arith.constant 8 : i32
    %64 = arith.muli %arg0, %c8_i32_20 : i32
    %65 = vector.broadcast %64 : i32 to vector<8x1xi32>
    %66 = arith.addi %65, %7 : vector<8x1xi32>
    %c4_i32_21 = arith.constant 4 : i32
    %67 = vector.broadcast %c4_i32_21 : i32 to vector<8x1xi32>
    %68 = arith.muli %66, %67 : vector<8x1xi32>
    %c1_i32 = arith.constant 1 : i32
    %69 = vector.broadcast %c1_i32 : i32 to vector<8x1xi32>
    %70 = arith.addi %68, %69 : vector<8x1xi32>
    %c16_i32_22 = arith.constant 16 : i32
    %71 = vector.broadcast %c16_i32_22 : i32 to vector<8x1xi32>
    %72 = arith.cmpi slt, %70, %71 : vector<8x1xi32>
    %cst_23 = arith.constant 0.000000e+00 : f32
    %73 = vector.broadcast %cst_23 : f32 to vector<8x1xf32>
    %74 = arith.select %72, %63, %73 : vector<8x1xi1>, vector<8x1xf32>
    %75 = vector.shape_cast %74 : vector<8x1xf32> to vector<1x8x1xf32>
    %cst_24 = arith.constant dense<0.000000e+00> : vector<1xf32>
    %76 = vector.multi_reduction <add>, %75, %cst_24 [1, 2] : vector<1x8x1xf32> to vector<1xf32>
    %77 = vector.shape_cast %76 : vector<1xf32> to vector<1x1x1xf32>
    %78 = vector.extract %77[0, 0, 0] : f32 from vector<1x1x1xf32>
    %79 = arith.addf %43, %78 : f32
    %c64_i32_25 = arith.constant 64 : i32
    %80 = vector.broadcast %c64_i32_25 : i32 to vector<8x128xi32>
    %81 = arith.cmpi sge, %6, %80 : vector<8x128xi32>
    %c96_i32 = arith.constant 96 : i32
    %82 = vector.broadcast %c96_i32 : i32 to vector<8x128xi32>
    %83 = arith.cmpi slt, %6, %82 : vector<8x128xi32>
    %84 = arith.andi %81, %83 : vector<8x128xi1>
    %cst_26 = arith.constant 0.000000e+00 : f32
    %85 = vector.broadcast %cst_26 : f32 to vector<8x128xf32>
    %86 = arith.select %84, %4, %85 : vector<8x128xi1>, vector<8x128xf32>
    %cst_27 = arith.constant 0.000000e+00 : f32
    %87 = vector.broadcast %cst_27 : f32 to vector<8x128xf32>
    %88 = arith.select %84, %5, %87 : vector<8x128xi1>, vector<8x128xf32>
    %cst_28 = arith.constant dense<0.000000e+00> : vector<8xf32>
    %89 = vector.multi_reduction <add>, %86, %cst_28 [1] : vector<8x128xf32> to vector<8xf32>
    %90 = vector.shape_cast %89 : vector<8xf32> to vector<8x1xf32>
    %91 = math.sqrt %90 : vector<8x1xf32>
    %cst_29 = arith.constant dense<0.000000e+00> : vector<8xf32>
    %92 = vector.multi_reduction <add>, %88, %cst_29 [1] : vector<8x128xf32> to vector<8xf32>
    %93 = vector.shape_cast %92 : vector<8xf32> to vector<8x1xf32>
    %94 = math.sqrt %93 : vector<8x1xf32>
    %95 = arith.subf %91, %94 : vector<8x1xf32>
    %cst_30 = arith.constant 1.000000e+00 : f32
    %96 = vector.broadcast %cst_30 : f32 to vector<8x1xf32>
    %97 = arith.addf %95, %96 : vector<8x1xf32>
    %cst_31 = arith.constant 0.000000e+00 : f32
    %98 = vector.broadcast %cst_31 : f32 to vector<8x1xf32>
    %99 = arith.maximumf %97, %98 : vector<8x1xf32>
    %c8_i32_32 = arith.constant 8 : i32
    %100 = arith.muli %arg0, %c8_i32_32 : i32
    %101 = vector.broadcast %100 : i32 to vector<8x1xi32>
    %102 = arith.addi %101, %7 : vector<8x1xi32>
    %c4_i32_33 = arith.constant 4 : i32
    %103 = vector.broadcast %c4_i32_33 : i32 to vector<8x1xi32>
    %104 = arith.muli %102, %103 : vector<8x1xi32>
    %c2_i32 = arith.constant 2 : i32
    %105 = vector.broadcast %c2_i32 : i32 to vector<8x1xi32>
    %106 = arith.addi %104, %105 : vector<8x1xi32>
    %c16_i32_34 = arith.constant 16 : i32
    %107 = vector.broadcast %c16_i32_34 : i32 to vector<8x1xi32>
    %108 = arith.cmpi slt, %106, %107 : vector<8x1xi32>
    %cst_35 = arith.constant 0.000000e+00 : f32
    %109 = vector.broadcast %cst_35 : f32 to vector<8x1xf32>
    %110 = arith.select %108, %99, %109 : vector<8x1xi1>, vector<8x1xf32>
    %111 = vector.shape_cast %110 : vector<8x1xf32> to vector<1x8x1xf32>
    %cst_36 = arith.constant dense<0.000000e+00> : vector<1xf32>
    %112 = vector.multi_reduction <add>, %111, %cst_36 [1, 2] : vector<1x8x1xf32> to vector<1xf32>
    %113 = vector.shape_cast %112 : vector<1xf32> to vector<1x1x1xf32>
    %114 = vector.extract %113[0, 0, 0] : f32 from vector<1x1x1xf32>
    %115 = arith.addf %79, %114 : f32
    %c96_i32_37 = arith.constant 96 : i32
    %116 = vector.broadcast %c96_i32_37 : i32 to vector<8x128xi32>
    %117 = arith.cmpi sge, %6, %116 : vector<8x128xi32>
    %c128_i32 = arith.constant 128 : i32
    %118 = vector.broadcast %c128_i32 : i32 to vector<8x128xi32>
    %119 = arith.cmpi slt, %6, %118 : vector<8x128xi32>
    %120 = arith.andi %117, %119 : vector<8x128xi1>
    %cst_38 = arith.constant 0.000000e+00 : f32
    %121 = vector.broadcast %cst_38 : f32 to vector<8x128xf32>
    %122 = arith.select %120, %4, %121 : vector<8x128xi1>, vector<8x128xf32>
    %cst_39 = arith.constant 0.000000e+00 : f32
    %123 = vector.broadcast %cst_39 : f32 to vector<8x128xf32>
    %124 = arith.select %120, %5, %123 : vector<8x128xi1>, vector<8x128xf32>
    %cst_40 = arith.constant dense<0.000000e+00> : vector<8xf32>
    %125 = vector.multi_reduction <add>, %122, %cst_40 [1] : vector<8x128xf32> to vector<8xf32>
    %126 = vector.shape_cast %125 : vector<8xf32> to vector<8x1xf32>
    %127 = math.sqrt %126 : vector<8x1xf32>
    %cst_41 = arith.constant dense<0.000000e+00> : vector<8xf32>
    %128 = vector.multi_reduction <add>, %124, %cst_41 [1] : vector<8x128xf32> to vector<8xf32>
    %129 = vector.shape_cast %128 : vector<8xf32> to vector<8x1xf32>
    %130 = math.sqrt %129 : vector<8x1xf32>
    %131 = arith.subf %127, %130 : vector<8x1xf32>
    %cst_42 = arith.constant 1.000000e+00 : f32
    %132 = vector.broadcast %cst_42 : f32 to vector<8x1xf32>
    %133 = arith.addf %131, %132 : vector<8x1xf32>
    %cst_43 = arith.constant 0.000000e+00 : f32
    %134 = vector.broadcast %cst_43 : f32 to vector<8x1xf32>
    %135 = arith.maximumf %133, %134 : vector<8x1xf32>
    %c8_i32_44 = arith.constant 8 : i32
    %136 = arith.muli %arg0, %c8_i32_44 : i32
    %137 = vector.broadcast %136 : i32 to vector<8x1xi32>
    %138 = arith.addi %137, %7 : vector<8x1xi32>
    %c4_i32_45 = arith.constant 4 : i32
    %139 = vector.broadcast %c4_i32_45 : i32 to vector<8x1xi32>
    %140 = arith.muli %138, %139 : vector<8x1xi32>
    %c3_i32 = arith.constant 3 : i32
    %141 = vector.broadcast %c3_i32 : i32 to vector<8x1xi32>
    %142 = arith.addi %140, %141 : vector<8x1xi32>
    %c16_i32_46 = arith.constant 16 : i32
    %143 = vector.broadcast %c16_i32_46 : i32 to vector<8x1xi32>
    %144 = arith.cmpi slt, %142, %143 : vector<8x1xi32>
    %cst_47 = arith.constant 0.000000e+00 : f32
    %145 = vector.broadcast %cst_47 : f32 to vector<8x1xf32>
    %146 = arith.select %144, %135, %145 : vector<8x1xi1>, vector<8x1xf32>
    %147 = vector.shape_cast %146 : vector<8x1xf32> to vector<1x8x1xf32>
    %cst_48 = arith.constant dense<0.000000e+00> : vector<1xf32>
    %148 = vector.multi_reduction <add>, %147, %cst_48 [1, 2] : vector<1x8x1xf32> to vector<1xf32>
    %149 = vector.shape_cast %148 : vector<1xf32> to vector<1x1x1xf32>
    %150 = vector.extract %149[0, 0, 0] : f32 from vector<1x1x1xf32>
    %151 = arith.addf %115, %150 : f32
    %152 = vector.broadcast %151 : f32 to vector<1x8x128xf32>
    %c0_49 = arith.constant 0 : index
    %c0_50 = arith.constant 0 : index
    %c0_51 = arith.constant 0 : index
    %153 = vector.load %arg2[%c0_49, %c0_50, %c0_51] : memref<1x8x128xf32, #tpu.memory_space<vmem>>, vector<1x8x128xf32>
    tpu.vector_store %arg2[%c0_49, %c0_50, %c0_51], %152 {strides = array<i32>} : memref<1x8x128xf32, #tpu.memory_space<vmem>>, vector<1x8x128xf32>,
    return
  }
  func.func @transform_0(%arg0: i32) -> (i32, i32, i32) {
    %c0_i32 = arith.constant 0 : i32
    %c0_i32_0 = arith.constant 0 : i32
    %c0_i32_1 = arith.constant 0 : i32
    return %c0_i32, %arg0, %c0_i32_0 : i32, i32, i32
  }
  func.func @transform_1(%arg0: i32) -> (i32, i32, i32) {
    %c0_i32 = arith.constant 0 : i32
    %c0_i32_0 = arith.constant 0 : i32
    %c0_i32_1 = arith.constant 0 : i32
    return %arg0, %c0_i32, %c0_i32_0 : i32, i32, i32
  }
}

</mosaic_0001>

<bundles_post_ra>
// kernel: transe_forward.1
= control target key start
LH: loop header
LB: loop body
LE: loop exit
PB: predicated region body
PF: predicated region fallthrough
CT: control target
= control target key end

     0   :  { %v13_v0 = vlaneseq  ;;  %vm49_vm15 = vcmask 7168   ;;  %s279_s0 = inlined_call_operand.vmem [shape: f32[2,8,128], index: 0, kind: input, shape index: {}]   ;;  %s280_s1 = inlined_call_operand.vmem [shape: f32[1,8,128], index: 1, kind: output, shape index: {}]  }
   0x1   :  { %v8_v1 = vld [vmem:[%s279_s0] sm:$0xff]  ;;  %v187_v2 = vld [vmem:[%s279_s0 + $0x8] sm:$0xff] }
   0x2   :  { %v11_v3 = vmul.f32 %v8_v1, %v8_v1  ;;  %v14_v4 = vand.u32 127, %v13_v0  ;;  %v12_v5 = vmul.f32 %v187_v2, %v187_v2  ;;  %v16_v17 = vshrl.u32 %v13_v0, 7 }
   0x4   :  { %vm18_vm0 = vcmp.lt.s32.totalorder %v14_v4, 32  ;;  %vm61_vm1 = vcmp.ge.s32.totalorder %v14_v4, 32  ;;  %vm62_vm2 = vcmp.lt.s32.totalorder %v14_v4, 64  ;;  %vm101_vm4 = vcmp.ge.s32.totalorder %v14_v4, 64 }
   0x5   :  { %v20_v6 = vsel %vm18_vm0, %v11_v3, 0.0  ;;  %vm63_vm3 = vmand %vm61_vm1, %vm62_vm2  ;;  %vm102_vm5 = vcmp.lt.s32.totalorder %v14_v4, 96  ;;  %v21_v8 = vsel %vm18_vm0, %v12_v5, 0.0  ;;  %vm141_vm7 = vcmp.ge.s32.totalorder %v14_v4, 96 }
   0x6   :  { %22 = vadd.xlane.f32.xlu0 %v20_v6  ;;  %v64_v7 = vsel %vm63_vm3, %v11_v3, 0.0  ;;  %v65_v9 = vsel %vm63_vm3, %v12_v5, 0.0  ;;  %vm103_vm6 = vmand %vm101_vm4, %vm102_vm5  ;;  %v144_v12 = vsel %vm141_vm7, %v11_v3, 0.0  ;;  %v145_v13 = vsel %vm141_vm7, %v12_v5, 0.0 }
   0x7   :  { %66 = vadd.xlane.f32.xlu1 %v64_v7  ;;  %v104_v10 = vsel %vm103_vm6, %v11_v3, 0.0  ;;  %v105_v11 = vsel %vm103_vm6, %v12_v5, 0.0  ;;  %v228_v20 = vmul.u32 4, %v16_v17 }
   0x9   :  { %v236_v26 = vadd.s32 1, %v228_v20  ;;  %v243_v29 = vadd.s32 2, %v228_v20  ;;  %vm47_vm10 = vcmp.lt.s32.totalorder %v228_v20, 16 }
   0xa   :  { %31 = vadd.xlane.f32.xlu0 %v21_v8 }
   0xb   :  { %75 = vadd.xlane.f32.xlu1 %v65_v9  ;;  %vm88_vm0 = vcmp.lt.s32.totalorder %v236_v26, 16 }
   0xe   :  { %106 = vadd.xlane.f32.xlu0 %v104_v10 }
   0xf   :  { %115 = vadd.xlane.f32.xlu1 %v105_v11 }
  0x12   :  { %146 = vadd.xlane.f32.xlu0 %v144_v12 }
  0x13   :  { %155 = vadd.xlane.f32.xlu1 %v145_v13 }
  0x93   :  { %v23_v14 = vpop.xlane.xlu0 %22 }
  0x94   :  { %196 = vrsqrt.f32 %v23_v14  ;;  %v67_v15 = vpop.xlane.xlu1 %66  ;;  %vm26_vm8 = vcmp.eq.f32.partialorder %v23_v14, inf  ;;  %vm28_vm9 = vcmp.eq.f32.partialorder %v23_v14, 0.0  ;;  %v29_v31 = vand.u32 2147483648, %v23_v14 }
  0x95   :  { %198 = vrsqrt.f32 %v67_v15  ;;  %vm70_vm11 = vcmp.eq.f32.partialorder %v67_v15, inf  ;;  %vm72_vm12 = vcmp.eq.f32.partialorder %v67_v15, 0.0  ;;  %v73_v32 = vand.u32 2147483648, %v67_v15 }
  0x97   :  { %v32_v16 = vpop.xlane.xlu0 %31 }
  0x98   :  { %200 = vrsqrt.f32 %v32_v16  ;;  %v76_v18 = vpop.xlane.xlu1 %75  ;;  %vm35_vm13 = vcmp.eq.f32.partialorder %v32_v16, inf  ;;  %vm37_vm14 = vcmp.eq.f32.partialorder %v32_v16, 0.0  ;;  %v38_v37 = vand.u32 2147483648, %v32_v16 }
  0x99   :  { %202 = vrsqrt.f32 %v76_v18  ;;  %vm79_vm1 = vcmp.eq.f32.partialorder %v76_v18, inf  ;;  %vm81_vm2 = vcmp.eq.f32.partialorder %v76_v18, 0.0  ;;  %v82_v40 = vand.u32 2147483648, %v76_v18 }
  0x9b   :  { %v107_v19 = vpop.xlane.xlu0 %106 }
  0x9c   :  { %204 = vrsqrt.f32 %v107_v19  ;;  %v230_v21 = vpop.xlane.xlu1 %115  ;;  %vm110_vm3 = vcmp.eq.f32.partialorder %v107_v19, inf  ;;  %vm112_vm4 = vcmp.eq.f32.partialorder %v107_v19, 0.0  ;;  %v113_v52 = vand.u32 2147483648, %v107_v19 }
  0x9d   :  { %206 = vrsqrt.f32 %v230_v21  ;;  %vm119_vm5 = vcmp.eq.f32.partialorder %v230_v21, inf  ;;  %vm121_vm6 = vcmp.eq.f32.partialorder %v230_v21, 0.0  ;;  %v122_v55 = vand.u32 2147483648, %v230_v21 }
  0x9e   :  { %v197_v22 = vpop.eup %196 }
  0x9f   :  { %v199_v23 = vpop.eup %198  ;;  %v25_v24 = vmul.f32 %v197_v22, %v23_v14  ;;  %v233_v25 = vpop.xlane.xlu0 %146 }
  0xa0   :  { %v69_v27 = vmul.f32 %v199_v23, %v67_v15  ;;  %208 = vrsqrt.f32 %v233_v25  ;;  %v239_v28 = vpop.xlane.xlu1 %155  ;;  %vm150_vm7 = vcmp.eq.f32.partialorder %v233_v25, inf  ;;  %v153_v3 = vand.u32 2147483648, %v233_v25 }
  0xa1   :  { %210 = vrsqrt.f32 %v239_v28  ;;  %v27_v35 = vsel %vm26_vm8, %v23_v14, %v25_v24  ;;  %vm152_vm8 = vcmp.eq.f32.partialorder %v233_v25, 0.0  ;;  %v162_v6 = vand.u32 2147483648, %v239_v28 }
  0xa2   :  { %v201_v30 = vpop.eup %200  ;;  %v71_v38 = vsel %vm70_vm11, %v67_v15, %v69_v27  ;;  %v30_v42 = vsel %vm28_vm9, %v29_v31, %v27_v35  ;;  %vm159_vm9 = vcmp.eq.f32.partialorder %v239_v28, inf  ;;  %vm128_vm11 = vcmp.lt.s32.totalorder %v243_v29, 16 }
  0xa3   :  { %v203_v33 = vpop.eup %202  ;;  %v34_v34 = vmul.f32 %v201_v30, %v32_v16  ;;  %v74_v48 = vsel %vm72_vm12, %v73_v32, %v71_v38  ;;  %v167_v15 = vadd.s32 3, %v228_v20 }
  0xa4   :  { %v78_v36 = vmul.f32 %v203_v33, %v76_v18 }
  0xa5   :  { %v36_v39 = vsel %vm35_vm13, %v32_v16, %v34_v34  ;;  %vm168_vm12 = vcmp.lt.s32.totalorder %v167_v15, 16 }
  0xa6   :  { %v205_v41 = vpop.eup %204  ;;  %v39_v43 = vsel %vm37_vm14, %v38_v37, %v36_v39  ;;  %v80_v44 = vsel %vm79_vm1, %v76_v18, %v78_v36 }
  0xa7   :  { %v207_v45 = vpop.eup %206  ;;  %v109_v46 = vmul.f32 %v205_v41, %v107_v19  ;;  %v40_v47 = vsub.f32 %v30_v42, %v39_v43  ;;  %v83_v49 = vsel %vm81_vm2, %v82_v40, %v80_v44 }
  0xa8   :  { %v118_v50 = vmul.f32 %v207_v45, %v230_v21  ;;  %v84_v51 = vsub.f32 %v74_v48, %v83_v49 }
  0xa9   :  { %v41_v53 = vadd.f32 1.0, %v40_v47  ;;  %v111_v54 = vsel %vm110_vm3, %v107_v19, %v109_v46 }
  0xaa   :  { %v209_v56 = vpop.eup %208  ;;  %v85_v57 = vadd.f32 1.0, %v84_v51  ;;  %v114_v58 = vsel %vm112_vm4, %v113_v52, %v111_v54  ;;  %v120_v59 = vsel %vm119_vm5, %v230_v21, %v118_v50 }
  0xab   :  { %v211_v60 = vpop.eup %210  ;;  %v149_v61 = vmul.f32 %v209_v56, %v233_v25  ;;  %v42_v62 = vmax.f32 %v41_v53, 0.0  ;;  %v123_v63 = vsel %vm121_vm6, %v122_v55, %v120_v59 }
  0xac   :  { %v158_v0 = vmul.f32 %v211_v60, %v239_v28  ;;  %v86_v1 = vmax.f32 %v85_v57, 0.0  ;;  %v124_v2 = vsub.f32 %v114_v58, %v123_v63 }
  0xad   :  { %v48_v4 = vsel %vm47_vm10, %v42_v62, 0.0  ;;  %v151_v5 = vsel %vm150_vm7, %v233_v25, %v149_v61  ;;  %vm161_vm10 = vcmp.eq.f32.partialorder %v239_v28, 0.0 }
  0xae   :  { %v50_v7 = vsel %vm49_vm15, %v48_v4, 0.0  ;;  %v89_v8 = vsel %vm88_vm0, %v86_v1, 0.0  ;;  %v125_v9 = vadd.f32 1.0, %v124_v2  ;;  %v154_v10 = vsel %vm152_vm8, %v153_v3, %v151_v5 }
  0xaf   :  { %51 = vadd.xlane.f32.xlu0 %v50_v7  ;;  %v90_v11 = vsel %vm49_vm15, %v89_v8, 0.0  ;;  %v160_v12 = vsel %vm159_vm9, %v239_v28, %v158_v0 }
  0xb0   :  { %91 = vadd.xlane.f32.xlu1 %v90_v11  ;;  %v126_v13 = vmax.f32 %v125_v9, 0.0  ;;  %v163_v14 = vsel %vm161_vm10, %v162_v6, %v160_v12 }
  0xb1   :  { %v164_v16 = vsub.f32 %v154_v10, %v163_v14 }
  0xb2   :  { %v129_v17 = vsel %vm128_vm11, %v126_v13, 0.0 }
  0xb3   :  { %v130_v18 = vsel %vm49_vm15, %v129_v17, 0.0  ;;  %v165_v19 = vadd.f32 1.0, %v164_v16 }
  0xb4   :  { %131 = vadd.xlane.f32.xlu0 %v130_v18 }
  0xb5   :  { %v166_v21 = vmax.f32 %v165_v19, 0.0 }
  0xb7   :  { %v169_v22 = vsel %vm168_vm12, %v166_v21, 0.0 }
  0xb8   :  { %v170_v23 = vsel %vm49_vm15, %v169_v22, 0.0 }
  0xb9   :  { %171 = vadd.xlane.f32.xlu1 %v170_v23 }
 0x13c   :  { %v52_v24 = vpop.xlane.xlu0 %51 }
 0x13d   :  { %v53_v25 = vrot.slane %v52_v24, 4  ;;  %v92_v26 = vpop.xlane.xlu1 %91 }
 0x13e   :  { %v93_v27 = vrot.slane %v92_v26, 4 }
 0x13f   :  { %v54_v28 = vadd.f32 %v53_v25, %v52_v24 }
 0x140   :  { %v94_v29 = vadd.f32 %v93_v27, %v92_v26 }
 0x141   :  { %v55_v30 = vrot.slane %v54_v28, 2  ;;  %v132_v20 = vpop.xlane.xlu0 %131 }
 0x142   :  { %v95_v31 = vrot.slane %v94_v29, 2  ;;  %v133_v32 = vrot.slane %v132_v20, 4 }
 0x143   :  { %v56_v33 = vadd.f32 %v55_v30, %v54_v28 }
 0x144   :  { %v134_v34 = vadd.f32 %v133_v32, %v132_v20  ;;  %v96_v35 = vadd.f32 %v95_v31, %v94_v29 }
 0x145   :  { %v57_v36 = vrot.slane %v56_v33, 1 }
 0x146   :  { %v135_v37 = vrot.slane %v134_v34, 2  ;;  %v172_v38 = vpop.xlane.xlu1 %171  ;;  %v97_v39 = vrot.slane %v96_v35, 1 }
 0x147   :  { %v173_v40 = vrot.slane %v172_v38, 4  ;;  %v58_v41 = vadd.f32 %v57_v36, %v56_v33 }
 0x148   :  { %v136_v42 = vadd.f32 %v135_v37, %v134_v34  ;;  %v98_v43 = vadd.f32 %v97_v39, %v96_v35 }
 0x149   :  { %v174_v44 = vadd.f32 %v173_v40, %v172_v38  ;;  %188 = vpush %v58_v41 }
 0x14a   :  { %190 = vpush %v98_v43  ;;  %v137_v45 = vrot.slane %v136_v42, 1 }
 0x14b   :  { %v175_v46 = vrot.slane %v174_v44, 2 }
 0x14c   :  { %v138_v47 = vadd.f32 %v137_v45, %v136_v42 }
 0x14d   :  { %v176_v48 = vadd.f32 %v175_v46, %v174_v44 }
 0x14e   :  { %192 = vpush %v138_v47 }
 0x14f   :  { %v177_v49 = vrot.slane %v176_v48, 1 }
 0x151   :  { %v178_v50 = vadd.f32 %v177_v49, %v176_v48 }
 0x153   :  { %194 = vpush %v178_v50 }
 0x17a   :  { %s189_s0 = spop %188 }
 0x17b   :  { %s191_s10 = spop %190 }
 0x17c   :  { %s100_s12 = sadd.f32 %s191_s10, %s189_s0 }
 0x17f   :  { %s193_s11 = spop %192 }
 0x180   :  { %s140_s13 = sadd.f32 %s193_s11, %s100_s12 }
 0x184   :  { %s195_s14 = spop %194 }
 0x185   :  { %s180_s15 = sadd.f32 %s195_s14, %s140_s13 }
 0x187   :  { %v181_v51 = vstv %s180_s15 }
 0x188   :  { %182 = vst [vmem:[%s280_s1] sm:$0xff] %v181_v51 }

</bundles_post_ra>
